<compile_context>
chip_gen: v6e
topology: v6e:2x2x1
jax: 0.10.0
libtpu: 0.0.40
codegen_flags: <defaults>
</compile_context>

<pallas_src>
import math
from functools import partial

import jax
import jax.numpy as jnp
from jax.experimental import pallas as pl
from jax.experimental.pallas import tpu as pltpu

# ---------------- config (small, deterministic) ----------------
B = 2          # batch
T = 8          # sequence length == block_size
C = 32         # n_embd
N_HEAD = 4
HEAD_DIM = C // N_HEAD

NEG_INF = -1e10        # matches the PyTorch module's masked_fill constant
CROSS_SEQ_NEG = -1e30  # hard-excludes cross-sequence keys created by batch flattening


# ---------------- fused Pallas kernel ----------------
def fused_attn_kernel(x_ref, wqkv_ref, bqkv_ref, wp_ref, bp_ref, mask_ref,
                      o_ref, y_ref, *, n_head):
    # x:    (S, C)   with S = B*T (batch flattened into sublanes)
    # wqkv: (C, 3C)  Q slice pre-scaled by 1/sqrt(head_dim)
    # bqkv: (1, 3C)
    # wp:   (C, C),  bp: (1, C)
    # mask: (S, S)   fill values: 0.0 = attend, -1e10 = masked (same seq), -1e30 = other seq
    # o:    (S, C)
    # y:    (S, C)   f32 VMEM scratch for the head merge
    s_total, c = x_ref.shape
    hd = c // n_head

    # ---- fused Q/K/V projection: one lane/sublane-dense (S,C) x (C,3C) matmul ----
    qkv = (jnp.dot(x_ref[...], wqkv_ref[...], preferred_element_type=jnp.float32)
           + bqkv_ref[...])                                        # (S, 3C) f32

    # ---- split heads into a leading batch dim: (nh, S, hd) ----
    def split_heads(base):
        return jnp.stack(
            [qkv[:, base + h * hd: base + (h + 1) * hd] for h in range(n_head)],
            axis=0)

    q = split_heads(0)          # (nh, S, hd), softmax scale already folded into W_q
    k = split_heads(c)
    v = split_heads(2 * c)

    # ---- all-head attention scores in ONE batched matmul: (nh, S, S) ----
    scores = jnp.einsum('hqd,hkd->hqk', q, k,
                        preferred_element_type=jnp.float32)

    # ---- fused causal + padding + same-sequence mask: single select ----
    mval = mask_ref[...]                                           # (S, S)
    scores = jnp.where(mval < -1.0, mval, scores)                  # bcast -> (nh, S, S)

    # ---- softmax over keys (f32, numerically stable) ----
    m = jnp.max(scores, axis=-1, keepdims=True)
    p = jnp.exp(scores - m)
    p = p / jnp.sum(p, axis=-1, keepdims=True)
    # TODO(synk): attn_drop would apply here in training mode.

    # ---- attention-weighted values for all heads in ONE batched matmul ----
    yh = jnp.einsum('hqk,hkd->hqd', p, v,
                    preferred_element_type=jnp.float32)            # (nh, S, hd)

    # ---- head merge: direct writes at fixed lane offsets (no concatenate) ----
    for h in range(n_head):
        y_ref[:, h * hd:(h + 1) * hd] = yh[h]

    # ---- output projection, lane-dense (S, C) store ----
    out = (jnp.dot(y_ref[...], wp_ref[...], preferred_element_type=jnp.float32)
           + bp_ref[...])
    o_ref[...] = out.astype(o_ref.dtype)
    # TODO(synk): resid_drop would apply here in training mode.


# ---------------- one-time parameter preparation ----------------
def prepare_fused_params(params):
    """Concat Q/K/V weights once and fold the 1/sqrt(head_dim) scale into Q."""
    scale = 1.0 / math.sqrt(HEAD_DIM)
    wqkv = jnp.concatenate(
        [params["wq"] * scale, params["wk"], params["wv"]], axis=1)   # (C, 3C)
    bqkv = jnp.concatenate(
        [params["bq"] * scale, params["bk"], params["bv"]], axis=1)   # (1, 3C)
    return {"wqkv": wqkv, "bqkv": bqkv, "wp": params["wp"], "bp": params["bp"]}


def build_mask_values(padding_mask, b, t):
    """(B*T, B*T) fill values: 0 = attend, -1e10 = masked same-seq, -1e30 = cross-seq."""
    s = b * t
    pos = jnp.arange(s)
    same_seq = (pos[:, None] // t) == (pos[None, :] // t)
    causal = pos[None, :] <= pos[:, None]
    if padding_mask is None:
        pad_keys = jnp.zeros((s,), bool)
    else:
        pad_keys = padding_mask.reshape(s) > 0.5
    allowed = same_seq & causal & (~pad_keys)[None, :]
    fill = jnp.where(same_seq, NEG_INF, CROSS_SEQ_NEG)
    return jnp.where(allowed, 0.0, fill).astype(jnp.float32)


# ---------------- wrapper ----------------
def causal_self_attention(x, fused, padding_mask=None):
    """x: (B, T, C) f32; padding_mask: (B, 1, T) with 1 = padded key.  Returns (B, T, C)."""
    b, t, c = x.shape
    s = b * t
    nh, hd = N_HEAD, c // N_HEAD

    x2 = x.reshape(s, c)                               # lane/sublane-dense slab
    mask_vals = build_mask_values(padding_mask, b, t)  # (S, S)

    cost = pl.CostEstimate(
        flops=2 * s * c * 3 * c + 2 * 2 * nh * s * s * hd + 2 * s * c * c,
        transcendentals=nh * s * s,
        bytes_accessed=4 * (2 * s * c + c * 3 * c + 3 * c + c * c + c + s * s),
    )

    out2 = pl.pallas_call(
        partial(fused_attn_kernel, n_head=nh),
        out_shape=jax.ShapeDtypeStruct((s, c), x.dtype),
        scratch_shapes=[pltpu.VMEM((s, c), jnp.float32)],
        cost_estimate=cost,
    )(x2, fused["wqkv"], fused["bqkv"], fused["wp"], fused["bp"], mask_vals)

    return out2.reshape(b, t, c)


# ---------------- pure-JAX reference (for verification) ----------------
def reference(x, params, padding_mask):
    b, t, c = x.shape
    nh, hd = N_HEAD, c // N_HEAD

    def lin(x_, w, bias):
        return x_ @ w + bias

    q = lin(x, params["wq"], params["bq"]).reshape(b, t, nh, hd).transpose(0, 2, 1, 3)
    k = lin(x, params["wk"], params["bk"]).reshape(b, t, nh, hd).transpose(0, 2, 1, 3)
    v = lin(x, params["wv"], params["bv"]).reshape(b, t, nh, hd).transpose(0, 2, 1, 3)

    att = (q @ jnp.swapaxes(k, -2, -1)) * (1.0 / math.sqrt(hd))
    causal = jnp.tril(jnp.ones((t, t)))[None, None]
    att = jnp.where(causal == 0, NEG_INF, att)
    if padding_mask is not None:
        att = jnp.where(padding_mask[:, :, None, :t] == 1, NEG_INF, att)
    att = jax.nn.softmax(att, axis=-1)
    y = att @ v
    y = y.transpose(0, 2, 1, 3).reshape(b, t, c)
    return lin(y, params["wp"], params["bp"])


# ---------------- parameter init (deterministic, PyTorch-Linear-like) ----------------
def init_params(key):
    params = {}
    names = [("wq", "bq"), ("wk", "bk"), ("wv", "bv"), ("wp", "bp")]
    bound = 1.0 / math.sqrt(C)
    for (wn, bn) in names:
        key, kw, kb = jax.random.split(key, 3)
        # stored already transposed: (Cin, Cout), so forward is x @ w + b
        params[wn] = jax.random.uniform(kw, (C, C), jnp.float32, -bound, bound)
        params[bn] = jax.random.uniform(kb, (1, C), jnp.float32, -bound, bound)
    return params


if __name__ == "__main__":
    key = jax.random.PRNGKey(0)
    key, kx = jax.random.split(key)
    params = init_params(key)
    fused = prepare_fused_params(params)   # one-time weight prep (concat + folded scale)

    x = jax.random.normal(kx, (B, T, C), jnp.float32)

    # pad out the last two key positions of batch element 1
    padding_mask = jnp.zeros((B, 1, T), jnp.float32)
    padding_mask = padding_mask.at[1, 0, T - 2:].set(1.0)

    out = jax.block_until_ready(causal_self_attention(x, fused, padding_mask))

    with jax.default_matmul_precision("highest"):
        ref = reference(x, params, padding_mask)

    assert out.shape == (B, T, C)
    assert jnp.allclose(out, ref, atol=2e-3, rtol=2e-3), "mismatch vs reference"

    print("KERNEL_OK")
</pallas_src>

<mosaic_0001>
module attributes {stable_mosaic.version = 11 : i64} {
  func.func @fused_attn_kernel(%arg0: memref<16x32xf32, #tpu.memory_space<vmem>>, %arg1: memref<32x96xf32, #tpu.memory_space<vmem>>, %arg2: memref<1x96xf32, #tpu.memory_space<vmem>>, %arg3: memref<32x32xf32, #tpu.memory_space<vmem>>, %arg4: memref<1x32xf32, #tpu.memory_space<vmem>>, %arg5: memref<16x16xf32, #tpu.memory_space<vmem>>, %arg6: memref<16x32xf32, #tpu.memory_space<vmem>>, %arg7: memref<16x32xf32, #tpu.memory_space<vmem>>) attributes {dimension_semantics = [], scalar_prefetch = 0 : i64, scratch_operands = 1 : i64, tpu.core_type = #tpu.core_type<tc>} {
    %c0 = arith.constant 0 : index
    %c0_0 = arith.constant 0 : index
    %0 = vector.load %arg0[%c0, %c0_0] : memref<16x32xf32, #tpu.memory_space<vmem>>, vector<16x32xf32>
    %c0_1 = arith.constant 0 : index
    %c0_2 = arith.constant 0 : index
    %1 = vector.load %arg1[%c0_1, %c0_2] : memref<32x96xf32, #tpu.memory_space<vmem>>, vector<32x96xf32>
    %cst = arith.constant dense<0.000000e+00> : vector<16x96xf32>
    %2 = tpu.matmul %0, %1, %cst {dimension_numbers = #tpu.dot_dimension_numbers<[1], [0], [0], [1], [0, 0, 1, 1], [], []>} : vector<16x32xf32>, vector<32x96xf32>, vector<16x96xf32> -> vector<16x96xf32>
    %c0_3 = arith.constant 0 : index
    %c0_4 = arith.constant 0 : index
    %3 = vector.load %arg2[%c0_3, %c0_4] : memref<1x96xf32, #tpu.memory_space<vmem>>, vector<1x96xf32>
    %4 = vector.broadcast %3 : vector<1x96xf32> to vector<16x96xf32>
    %5 = arith.addf %2, %4 : vector<16x96xf32>
    %6 = vector.extract_strided_slice %5 {offsets = [0, 0], sizes = [16, 8], strides = [1, 1]} : vector<16x96xf32> to vector<16x8xf32>
    %7 = vector.extract_strided_slice %5 {offsets = [0, 8], sizes = [16, 8], strides = [1, 1]} : vector<16x96xf32> to vector<16x8xf32>
    %8 = vector.extract_strided_slice %5 {offsets = [0, 16], sizes = [16, 8], strides = [1, 1]} : vector<16x96xf32> to vector<16x8xf32>
    %9 = vector.extract_strided_slice %5 {offsets = [0, 24], sizes = [16, 8], strides = [1, 1]} : vector<16x96xf32> to vector<16x8xf32>
    %10 = vector.shape_cast %6 : vector<16x8xf32> to vector<1x16x8xf32>
    %11 = vector.shape_cast %7 : vector<16x8xf32> to vector<1x16x8xf32>
    %12 = vector.shape_cast %8 : vector<16x8xf32> to vector<1x16x8xf32>
    %13 = vector.shape_cast %9 : vector<16x8xf32> to vector<1x16x8xf32>
    %14 = tpu.concatenate %10, %11, %12, %13 in 0 : vector<1x16x8xf32>, vector<1x16x8xf32>, vector<1x16x8xf32>, vector<1x16x8xf32> -> vector<4x16x8xf32>
    %15 = vector.extract_strided_slice %5 {offsets = [0, 32], sizes = [16, 8], strides = [1, 1]} : vector<16x96xf32> to vector<16x8xf32>
    %16 = vector.extract_strided_slice %5 {offsets = [0, 40], sizes = [16, 8], strides = [1, 1]} : vector<16x96xf32> to vector<16x8xf32>
    %17 = vector.extract_strided_slice %5 {offsets = [0, 48], sizes = [16, 8], strides = [1, 1]} : vector<16x96xf32> to vector<16x8xf32>
    %18 = vector.extract_strided_slice %5 {offsets = [0, 56], sizes = [16, 8], strides = [1, 1]} : vector<16x96xf32> to vector<16x8xf32>
    %19 = vector.shape_cast %15 : vector<16x8xf32> to vector<1x16x8xf32>
    %20 = vector.shape_cast %16 : vector<16x8xf32> to vector<1x16x8xf32>
    %21 = vector.shape_cast %17 : vector<16x8xf32> to vector<1x16x8xf32>
    %22 = vector.shape_cast %18 : vector<16x8xf32> to vector<1x16x8xf32>
    %23 = tpu.concatenate %19, %20, %21, %22 in 0 : vector<1x16x8xf32>, vector<1x16x8xf32>, vector<1x16x8xf32>, vector<1x16x8xf32> -> vector<4x16x8xf32>
    %24 = vector.extract_strided_slice %5 {offsets = [0, 64], sizes = [16, 8], strides = [1, 1]} : vector<16x96xf32> to vector<16x8xf32>
    %25 = vector.extract_strided_slice %5 {offsets = [0, 72], sizes = [16, 8], strides = [1, 1]} : vector<16x96xf32> to vector<16x8xf32>
    %26 = vector.extract_strided_slice %5 {offsets = [0, 80], sizes = [16, 8], strides = [1, 1]} : vector<16x96xf32> to vector<16x8xf32>
    %27 = vector.extract_strided_slice %5 {offsets = [0, 88], sizes = [16, 8], strides = [1, 1]} : vector<16x96xf32> to vector<16x8xf32>
    %28 = vector.shape_cast %24 : vector<16x8xf32> to vector<1x16x8xf32>
    %29 = vector.shape_cast %25 : vector<16x8xf32> to vector<1x16x8xf32>
    %30 = vector.shape_cast %26 : vector<16x8xf32> to vector<1x16x8xf32>
    %31 = vector.shape_cast %27 : vector<16x8xf32> to vector<1x16x8xf32>
    %32 = tpu.concatenate %28, %29, %30, %31 in 0 : vector<1x16x8xf32>, vector<1x16x8xf32>, vector<1x16x8xf32>, vector<1x16x8xf32> -> vector<4x16x8xf32>
    "tpu.trace_start"() <{level = 10 : i32, message = "hqd,hkd->hqk"}> : () -> ()
    %cst_5 = arith.constant dense<0.000000e+00> : vector<4x16x16xf32>
    %33 = tpu.matmul %14, %23, %cst_5 {dimension_numbers = #tpu.dot_dimension_numbers<[2], [2], [1], [1], [0, 0, 0, 1, 1, 1], [0], [0]>} : vector<4x16x8xf32>, vector<4x16x8xf32>, vector<4x16x16xf32> -> vector<4x16x16xf32>
    "tpu.trace_stop"() : () -> ()
    %c0_6 = arith.constant 0 : index
    %c0_7 = arith.constant 0 : index
    %34 = vector.load %arg5[%c0_6, %c0_7] : memref<16x16xf32, #tpu.memory_space<vmem>>, vector<16x16xf32>
    %cst_8 = arith.constant -1.000000e+00 : f32
    %35 = vector.broadcast %cst_8 : f32 to vector<16x16xf32>
    %36 = arith.cmpf olt, %34, %35 : vector<16x16xf32>
    %37 = vector.shape_cast %36 : vector<16x16xi1> to vector<1x16x16xi1>
    %38 = vector.broadcast %37 : vector<1x16x16xi1> to vector<4x16x16xi1>
    %39 = vector.shape_cast %34 : vector<16x16xf32> to vector<1x16x16xf32>
    %40 = vector.broadcast %39 : vector<1x16x16xf32> to vector<4x16x16xf32>
    %41 = arith.select %38, %40, %33 : vector<4x16x16xi1>, vector<4x16x16xf32>
    %cst_9 = arith.constant dense<0xFF800000> : vector<4x16xf32>
    %42 = vector.multi_reduction <maximumf>, %41, %cst_9 [2] : vector<4x16x16xf32> to vector<4x16xf32>
    %43 = vector.shape_cast %42 : vector<4x16xf32> to vector<4x16x1xf32>
    %44 = vector.broadcast %43 : vector<4x16x1xf32> to vector<4x16x16xf32>
    %45 = arith.subf %41, %44 : vector<4x16x16xf32>
    %46 = math.exp %45 : vector<4x16x16xf32>
    %cst_10 = arith.constant dense<0.000000e+00> : vector<4x16xf32>
    %47 = vector.multi_reduction <add>, %46, %cst_10 [2] : vector<4x16x16xf32> to vector<4x16xf32>
    %48 = vector.shape_cast %47 : vector<4x16xf32> to vector<4x16x1xf32>
    %49 = vector.broadcast %48 : vector<4x16x1xf32> to vector<4x16x16xf32>
    %50 = arith.divf %46, %49 : vector<4x16x16xf32>
    "tpu.trace_start"() <{level = 10 : i32, message = "hqk,hkd->hqd"}> : () -> ()
    %cst_11 = arith.constant dense<0.000000e+00> : vector<4x16x8xf32>
    %51 = tpu.matmul %50, %32, %cst_11 {dimension_numbers = #tpu.dot_dimension_numbers<[2], [1], [1], [2], [0, 0, 0, 1, 1, 2], [0], [0]>} : vector<4x16x16xf32>, vector<4x16x8xf32>, vector<4x16x8xf32> -> vector<4x16x8xf32>
    "tpu.trace_stop"() : () -> ()
    %52 = vector.extract_strided_slice %51 {offsets = [0, 0, 0], sizes = [1, 16, 8], strides = [1, 1, 1]} : vector<4x16x8xf32> to vector<1x16x8xf32>
    %53 = vector.shape_cast %52 : vector<1x16x8xf32> to vector<16x8xf32>
    %c0_12 = arith.constant 0 : index
    %c0_13 = arith.constant 0 : index
    %54 = vector.load %arg7[%c0_12, %c0_13] : memref<16x32xf32, #tpu.memory_space<vmem>>, vector<16x8xf32>
    tpu.vector_store %arg7[%c0_12, %c0_13], %53 {strides = array<i32>} : memref<16x32xf32, #tpu.memory_space<vmem>>, vector<16x8xf32>,
    %55 = vector.extract_strided_slice %51 {offsets = [1, 0, 0], sizes = [1, 16, 8], strides = [1, 1, 1]} : vector<4x16x8xf32> to vector<1x16x8xf32>
    %56 = vector.shape_cast %55 : vector<1x16x8xf32> to vector<16x8xf32>
    %c0_14 = arith.constant 0 : index
    %c8 = arith.constant 8 : index
    %57 = vector.load %arg7[%c0_14, %c8] : memref<16x32xf32, #tpu.memory_space<vmem>>, vector<16x8xf32>
    tpu.vector_store %arg7[%c0_14, %c8], %56 {strides = array<i32>} : memref<16x32xf32, #tpu.memory_space<vmem>>, vector<16x8xf32>,
    %58 = vector.extract_strided_slice %51 {offsets = [2, 0, 0], sizes = [1, 16, 8], strides = [1, 1, 1]} : vector<4x16x8xf32> to vector<1x16x8xf32>
    %59 = vector.shape_cast %58 : vector<1x16x8xf32> to vector<16x8xf32>
    %c0_15 = arith.constant 0 : index
    %c16 = arith.constant 16 : index
    %60 = vector.load %arg7[%c0_15, %c16] : memref<16x32xf32, #tpu.memory_space<vmem>>, vector<16x8xf32>
    tpu.vector_store %arg7[%c0_15, %c16], %59 {strides = array<i32>} : memref<16x32xf32, #tpu.memory_space<vmem>>, vector<16x8xf32>,
    %61 = vector.extract_strided_slice %51 {offsets = [3, 0, 0], sizes = [1, 16, 8], strides = [1, 1, 1]} : vector<4x16x8xf32> to vector<1x16x8xf32>
    %62 = vector.shape_cast %61 : vector<1x16x8xf32> to vector<16x8xf32>
    %c0_16 = arith.constant 0 : index
    %c24 = arith.constant 24 : index
    %63 = vector.load %arg7[%c0_16, %c24] : memref<16x32xf32, #tpu.memory_space<vmem>>, vector<16x8xf32>
    tpu.vector_store %arg7[%c0_16, %c24], %62 {strides = array<i32>} : memref<16x32xf32, #tpu.memory_space<vmem>>, vector<16x8xf32>,
    %c0_17 = arith.constant 0 : index
    %c0_18 = arith.constant 0 : index
    %64 = vector.load %arg7[%c0_17, %c0_18] : memref<16x32xf32, #tpu.memory_space<vmem>>, vector<16x32xf32>
    %c0_19 = arith.constant 0 : index
    %c0_20 = arith.constant 0 : index
    %65 = vector.load %arg3[%c0_19, %c0_20] : memref<32x32xf32, #tpu.memory_space<vmem>>, vector<32x32xf32>
    %cst_21 = arith.constant dense<0.000000e+00> : vector<16x32xf32>
    %66 = tpu.matmul %64, %65, %cst_21 {dimension_numbers = #tpu.dot_dimension_numbers<[1], [0], [0], [1], [0, 0, 1, 1], [], []>} : vector<16x32xf32>, vector<32x32xf32>, vector<16x32xf32> -> vector<16x32xf32>
    %c0_22 = arith.constant 0 : index
    %c0_23 = arith.constant 0 : index
    %67 = vector.load %arg4[%c0_22, %c0_23] : memref<1x32xf32, #tpu.memory_space<vmem>>, vector<1x32xf32>
    %68 = vector.broadcast %67 : vector<1x32xf32> to vector<16x32xf32>
    %69 = arith.addf %66, %68 : vector<16x32xf32>
    %c0_24 = arith.constant 0 : index
    %c0_25 = arith.constant 0 : index
    %70 = vector.load %arg6[%c0_24, %c0_25] : memref<16x32xf32, #tpu.memory_space<vmem>>, vector<16x32xf32>
    tpu.vector_store %arg6[%c0_24, %c0_25], %69 {strides = array<i32>} : memref<16x32xf32, #tpu.memory_space<vmem>>, vector<16x32xf32>,
    return
  }
}

</mosaic_0001>

<bundles_post_ra>
// kernel: tpu_custom_call.1
= control target key start
LH: loop header
LB: loop body
LE: loop exit
PB: predicated region body
PF: predicated region fallthrough
CT: control target
= control target key end

     0   :  { %11 = vsyncpa [#allocation4], 0  ;;  %s1659_s0 = inlined_call_operand.hbm [shape: f32[16,32], index: 0, kind: input, shape index: {}]   ;;  %s1660_s1 = inlined_call_operand.hbm [shape: f32[32,96], index: 1, kind: input, shape index: {}]   ;;  %s1661_s2 = inlined_call_operand.vmem [shape: f32[1,96], index: 2, kind: input, shape index: {}]   ;;  %s1662_s3 = inlined_call_operand.hbm [shape: f32[32,32], index: 3, kind: input, shape index: {}]   ;;  %s1663_s4 = inlined_call_operand.vmem [shape: f32[1,32], index: 4, kind: input, shape index: {}]   ;;  %s1664_s5 = inlined_call_operand.hbm [shape: f32[16,16], index: 5, kind: input, shape index: {}]   ;;  %s1665_s6 = inlined_call_operand.hbm [shape: f32[16,32], index: 6, kind: output, shape index: {}]  }
   0x1   :  { %12 = vsyncpa [#allocation7], 0 }
   0x2   :  { %13 = vsyncpa [#allocation10], 0 }
   0x3   :  { %14 = vsyncpa [#allocation5], 0  ;;  %s1446_s21 = smov [#allocation6]   ;;  %s1447_s23 = smov [#allocation3]  }
   0x4   :  { %s32_s22 = sshll.u32 %s1446_s21, 4  ;;  %s20_s24 = sshll.u32 %s1447_s23, 4  ;;  %s33_s22 = int_to_ptr.vmem [resolvable:$true] %s32_s22  ;;  %s21_s24 = int_to_ptr.vmem [resolvable:$true] %s20_s24 }
   0x5   :  { %s1346_s25 = scalar_lea.vmem %s33_s22, 512  ;;  %p1351_p1 = scmp.lt.s32.totalorder %s33_s22, %s33_s22 }
   0x6   :  { %p1347_p0 = scmp.ne.s32.totalorder %s33_s22, %s1346_s25  ;;  %p1352_p2 = scmp.lt.s32.totalorder %s1346_s25, %s1346_s25 }
   0x8   :  { %p1353_p3 = por %p1352_p2, %p1351_p1 }
   0xa   :  { %p1354_p4 = pnand %p1353_p3, %p1347_p0 }
   0xc   :  { %1357 = shalt.err (!%p1354_p4)
}
   0xd   :  { %s1448_s26 = smov 128   ;;  %s1449_s27 = smov 8  }
   0xe   :  { %38 = dma.hbm_to_vmem [thread:$0]  %s1660_s1, 512, %s33_s22, [#allocation7], %s1448_s26, %s1448_s26, %s1449_s27  }
   0xf   :  { %s1366_s30 = scalar_lea.vmem %s21_s24, 256  ;;  %p1371_p6 = scmp.lt.s32.totalorder %s21_s24, %s21_s24 }
  0x10   :  { %p1367_p5 = scmp.ne.s32.totalorder %s21_s24, %s1366_s30  ;;  %p1372_p7 = scmp.lt.s32.totalorder %s1366_s30, %s1366_s30 }
  0x12   :  { %p1373_p8 = por %p1372_p7, %p1371_p6 }
  0x14   :  { %p1374_p9 = pnand %p1373_p8, %p1367_p5 }
  0x16   :  { %1377 = shalt.err (!%p1374_p9)
}
  0x17   :  { %26 = dma.hbm_to_vmem [thread:$0]  %s1659_s0, 256, %s21_s24, [#allocation4], %s1448_s26, %s1448_s26, %s1449_s27  }
  0x18   :  { %s1450_s9 = smov [#allocation8]   ;;  %s1451_s11 = smov [#allocation9]  }
  0x19   :  { %s46_s10 = sshll.u32 %s1450_s9, 4  ;;  %s60_s12 = sshll.u32 %s1451_s11, 4  ;;  %s47_s10 = int_to_ptr.vmem [resolvable:$true] %s46_s10  ;;  %s61_s12 = int_to_ptr.vmem [resolvable:$true] %s60_s12 }
  0x1a   :  { %s1386_s1 = scalar_lea.vmem %s47_s10, 512  ;;  %p1391_p11 = scmp.lt.s32.totalorder %s47_s10, %s47_s10 }
  0x1b   :  { %p1387_p10 = scmp.ne.s32.totalorder %s47_s10, %s1386_s1  ;;  %p1392_p12 = scmp.lt.s32.totalorder %s1386_s1, %s1386_s1 }
  0x1d   :  { %p1393_p13 = por %p1392_p12, %p1391_p11 }
  0x1f   :  { %p1394_p0 = pnand %p1393_p13, %p1387_p10 }
  0x21   :  { %1397 = shalt.err (!%p1394_p0)
}
  0x22   :  { %52 = dma.hbm_to_vmem [thread:$0]  %s1662_s3, 512, %s47_s10, [#allocation7], %s1448_s26, %s1448_s26, %s1449_s27  }
  0x23   :  { %s1406_s0 = scalar_lea.vmem %s61_s12, 256  ;;  %p1411_p2 = scmp.lt.s32.totalorder %s61_s12, %s61_s12 }
  0x24   :  { %p1407_p1 = scmp.ne.s32.totalorder %s61_s12, %s1406_s0  ;;  %p1412_p3 = scmp.lt.s32.totalorder %s1406_s0, %s1406_s0 }
  0x26   :  { %p1413_p4 = por %p1412_p3, %p1411_p2 }
  0x28   :  { %p1414_p5 = pnand %p1413_p4, %p1407_p1 }
  0x2a   :  { %1417 = shalt.err (!%p1414_p5)
}
  0x2b   :  { %66 = dma.hbm_to_vmem [thread:$0]  %s1664_s5, 256, %s61_s12, [#allocation10], %s1448_s26, %s1448_s26, %s1449_s27  }
  0x2c   :  { %1438 = dma.done.wait [#allocation4], 256  }
  0x2d   :  { %1439 = vsyncadd [#allocation4], 4294967040 }
  0x2e   :  { %1440 = dma.done.wait [#allocation7], 1024  }
  0x2f   :  { %1441 = vsyncadd [#allocation7], 4294966272 }
  0x30   :  { %1442 = dma.done.wait [#allocation10], 256  }
  0x31   :  { %1443 = vsyncadd [#allocation10], 4294967040  ;;  %vm92_vm0 = vcmask 261120   ;;  %v84_v0 = vld [vmem:[#allocation6 + $0x18] sm:$0xff]  ;;  %v83_v1 = vld [vmem:[#allocation6 + $0x10] sm:$0xff]  ;;  %vm192_vm1 = vcmask 64512  }
  0x32   :  { %1214 = vmatprep.subr.mxu0 %v84_v0  ;;  %v79_v2 = vld [vmem:[#allocation3] sm:$0xff]  ;;  %v82_v3 = vld [vmem:[#allocation6 + $0x8] sm:$0xff]  ;;  %v81_v4 = vld [vmem:[#allocation6] sm:$0xff]  ;;  %s1452_s17 = smov 112   ;;  %s1453_s18 = smov 120   ;;  %vm553_vm3 = vcmask 130048  }
  0x33   :  { %1215 = vmatpush3.msra.mxu0 %v84_v0  ;;  %1222 = vmatprep.mubr.msk.f32.mxu0 %vm92_vm0, %v79_v2  ;;  %v80_v5 = vld [vmem:[#allocation3 + $0x8] sm:$0xff]  ;;  %v1140_v6 = vld [vmem:[%s1661_s2] ss:$0 sm:$0xff]  ;;  %s1454_s2 = smov 104   ;;  %s1455_s19 = smov 96   ;;  %v538_v25 = vld [vmem:[#allocation9 + $0x8] sm:$0xff] }
  0x34   :  { %1216 = vmatprep.subr.mxu0 %v83_v1  ;;  %v537_v26 = vld [vmem:[#allocation9] sm:$0xff]  ;;  %vm540_vm2 = vcmp.lt.f32.partialorder %v538_v25, -1.0  ;;  %s1456_s20 = smov 64   ;;  %s1457_s21 = smov 16   ;;  %vm1000_vm5 = vcmask 130112   ;;  %vm1011_vm6 = vcmask 195712  }
  0x35   :  { %1217 = vmatpush3.msra.mxu0 %v83_v1  ;;  %vm539_vm4 = vcmp.lt.f32.partialorder %v537_v26, -1.0  ;;  %s1458_s22 = smov 24   ;;  %vm1022_vm7 = vcmask 261312   ;;  %s1459_s25 = smov [#allocation11]  }
  0x36   :  { %1218 = vmatprep.subr.mxu0 %v82_v3  ;;  %s1126_s28 = sshll.u32 %s1459_s25, 4  ;;  %s1127_s28 = int_to_ptr.vmem [resolvable:$true] %s1126_s28 }
  0x37   :  { %1219 = vmatpush3.msra.mxu0 %v82_v3  ;;  %s1418_s29 = scalar_lea.vmem %s1127_s28, 256  ;;  %p1423_p7 = scmp.lt.s32.totalorder %s1127_s28, %s1127_s28 }
  0x38   :  { %1220 = vmatprep.subr.mxu0 %v81_v4  ;;  %p1419_p6 = scmp.ne.s32.totalorder %s1127_s28, %s1418_s29  ;;  %p1424_p8 = scmp.lt.s32.totalorder %s1418_s29, %s1418_s29 }
  0x39   :  { %1221 = vmatpush3.msra.mxu0 %v81_v4 }
  0x3a   :  { %1223 = vmatmul.mubr.msk.f32.vlgmr.msra.gmra.mxu0 %vm92_vm0, %v80_v5  ;;  %p1425_p9 = por %p1424_p8, %p1423_p7 }
  0x3c   :  { %p1426_p10 = pnand %p1425_p9, %p1419_p6 }
  0xfa   :  { %v1224_v7 = vpop.f32.mrf.mxu0 }
  0xfb   :  { %v1524_v8 = vadd.f32 %v1224_v7, %v1140_v6 }
  0xfc   :  { %v165_v9 = vpop.f32.mrf.mxu0 }
  0xfd   :  { %v1526_v10 = vadd.f32 %v1140_v6, %v165_v9  ;;  %182 = vrot.lane.b32.xlu1 %v1524_v8, %s1452_s17  ;;  %178 = vrot.lane.b32.xlu0 %v1524_v8, %s1453_s18 }
  0xff   :  { %1229 = vmatprep.mubr.msk.f32.mxu1 %vm192_vm1, %v1526_v10 }
 0x101   :  { %180 = vrot.lane.b32.xlu1 %v1526_v10, %s1452_s17  ;;  %176 = vrot.lane.b32.xlu0 %v1526_v10, %s1453_s18 }
 0x105   :  { %184 = vrot.lane.b32.xlu1 %v1526_v10, %s1454_s2  ;;  %186 = vrot.lane.b32.xlu0 %v1524_v8, %s1454_s2 }
 0x109   :  { %188 = vrot.lane.b32.xlu1 %v1526_v10, %s1455_s19  ;;  %190 = vrot.lane.b32.xlu0 %v1524_v8, %s1455_s19 }
 0x16f   :  { %v1538_v11 = vpop.permute.xlu1 %182  ;;  %v1540_v12 = vpop.permute.xlu0 %178 }
 0x170   :  { %278 = vrot.lane.b32.xlu0 %v1540_v12, %s1455_s19 }
 0x173   :  { %v1543_v13 = vpop.permute.xlu1 %180  ;;  %v1545_v14 = vpop.permute.xlu0 %176 }
 0x174   :  { %365 = vrot.lane.b32.xlu0 %v1538_v11, %s1455_s19  ;;  %1236 = vmatprep.mubr.msk.f32.mxu0 %vm192_vm1, %v1545_v14 }
 0x175   :  { %276 = vrot.lane.b32.xlu1 %v1545_v14, %s1455_s19 }
 0x177   :  { %v1551_v15 = vpop.permute.xlu1 %184  ;;  %v1553_v16 = vpop.permute.xlu0 %186 }
 0x178   :  { %452 = vrot.lane.b32.xlu0 %v1553_v16, %s1455_s19 }
 0x179   :  { %363 = vrot.lane.b32.xlu1 %v1543_v13, %s1455_s19 }
 0x17b   :  { %v191_v17 = vpop.permute.xlu0 %190  ;;  %v189_v18 = vpop.permute.xlu1 %188 }
 0x17c   :  { %1225 = vmatprep.subr.msk.mxu1 %vm192_vm1, %v191_v17 }
 0x17d   :  { %450 = vrot.lane.b32.xlu1 %v1551_v15, %s1455_s19  ;;  %1226 = vmatpush3.xpose.msk.msra.mxu1 %vm192_vm1, %v191_v17 }
 0x17e   :  { %1227 = vmatprep.subr.msk.mxu1 %vm192_vm1, %v189_v18 }
 0x181   :  { %1228 = vmatpush3.xpose.msk.msra.mxu1 %vm192_vm1, %v189_v18 }
 0x184   :  { %1230 = vmatmul.mubr.msk.f32.vlgmr.msra.gmra.mxu1 %vm192_vm1, %v1524_v8 }
 0x185   :  { %1243 = vmatprep.mubr.msk.f32.mxu1 %vm192_vm1, %v1543_v13 }
 0x1e2   :  { %v279_v19 = vpop.permute.xlu0 %278 }
 0x1e3   :  { %1232 = vmatprep.subr.msk.mxu0 %vm192_vm1, %v279_v19 }
 0x1e4   :  { %1233 = vmatpush3.xpose.msk.msra.mxu0 %vm192_vm1, %v279_v19 }
 0x1e6   :  { %v366_v20 = vpop.permute.xlu0 %365 }
 0x1e7   :  { %v277_v21 = vpop.permute.xlu1 %276  ;;  %1239 = vmatprep.subr.msk.mxu1 %vm192_vm1, %v366_v20 }
 0x1e8   :  { %1234 = vmatprep.subr.msk.mxu0 %vm192_vm1, %v277_v21  ;;  %1240 = vmatpush3.xpose.msk.msra.mxu1 %vm192_vm1, %v366_v20 }
 0x1e9   :  { %1235 = vmatpush3.xpose.msk.msra.mxu0 %vm192_vm1, %v277_v21 }
 0x1ea   :  { %v453_v22 = vpop.permute.xlu0 %452 }
 0x1eb   :  { %v364_v23 = vpop.permute.xlu1 %363  ;;  %1246 = vmatprep.subr.msk.mxu0 %vm192_vm1, %v453_v22 }
 0x1ec   :  { %1237 = vmatmul.mubr.msk.f32.vlgmr.msra.gmra.mxu0 %vm192_vm1, %v1540_v12  ;;  %1241 = vmatprep.subr.msk.mxu1 %vm192_vm1, %v364_v23 }
 0x1ed   :  { %1242 = vmatpush3.xpose.msk.msra.mxu1 %vm192_vm1, %v364_v23  ;;  %1247 = vmatpush3.xpose.msk.msra.mxu0 %vm192_vm1, %v453_v22 }
 0x1ee   :  { %1250 = vmatprep.mubr.msk.f32.mxu0 %vm192_vm1, %v1551_v15 }
 0x1ef   :  { %v451_v24 = vpop.permute.xlu1 %450 }
 0x1f0   :  { %1244 = vmatmul.mubr.msk.f32.vlgmr.msra.gmra.mxu1 %vm192_vm1, %v1538_v11  ;;  %1248 = vmatprep.subr.msk.mxu0 %vm192_vm1, %v451_v24 }
 0x1f1   :  { %1249 = vmatpush3.xpose.msk.msra.mxu0 %vm192_vm1, %v451_v24 }
 0x1f4   :  { %1251 = vmatmul.mubr.msk.f32.vlgmr.msra.gmra.mxu0 %vm192_vm1, %v1553_v16 }
 0x244   :  { %v1231_v27 = vpop.f32.mrf.mxu1 }
 0x245   :  { %v546_v28 = vsel %vm540_vm2, %v538_v25, %v1231_v27 }
 0x246   :  { %v267_v29 = vpop.f32.mrf.mxu1  ;;  %v557_v30 = vsel %vm553_vm3, %v546_v28, -inf }
 0x247   :  { %558 = vmax.xlane.f32.xlu1 %v557_v30  ;;  %v545_v31 = vsel %vm539_vm4, %v537_v26, %v267_v29 }
 0x248   :  { %v554_v32 = vsel %vm553_vm3, %v545_v31, -inf }
 0x249   :  { %555 = vmax.xlane.f32.xlu0 %v554_v32 }
 0x2ac   :  { %v1238_v33 = vpop.f32.mrf.mxu0 }
 0x2ad   :  { %v548_v38 = vsel %vm540_vm2, %v538_v25, %v1238_v33 }
 0x2ae   :  { %v354_v34 = vpop.f32.mrf.mxu0  ;;  %v563_v42 = vsel %vm553_vm3, %v548_v38, -inf }
 0x2af   :  { %v547_v35 = vsel %vm539_vm4, %v537_v26, %v354_v34 }
 0x2b0   :  { %v1245_v36 = vpop.f32.mrf.mxu1  ;;  %v560_v37 = vsel %vm553_vm3, %v547_v35, -inf }
 0x2b1   :  { %561 = vmax.xlane.f32.xlu0 %v560_v37  ;;  %v550_v44 = vsel %vm540_vm2, %v538_v25, %v1245_v36 }
 0x2b2   :  { %v441_v39 = vpop.f32.mrf.mxu1  ;;  %v569_v47 = vsel %vm553_vm3, %v550_v44, -inf }
 0x2b3   :  { %v549_v40 = vsel %vm539_vm4, %v537_v26, %v441_v39 }
 0x2b4   :  { %v1252_v41 = vpop.f32.mrf.mxu0  ;;  %v566_v43 = vsel %vm553_vm3, %v549_v40, -inf }
 0x2b5   :  { %564 = vmax.xlane.f32.xlu0 %v563_v42  ;;  %567 = vmax.xlane.f32.xlu1 %v566_v43  ;;  %v552_v49 = vsel %vm540_vm2, %v538_v25, %v1252_v41 }
 0x2b6   :  { %v528_v45 = vpop.f32.mrf.mxu0  ;;  %v575_v50 = vsel %vm553_vm3, %v552_v49, -inf }
 0x2b7   :  { %v551_v46 = vsel %vm539_vm4, %v537_v26, %v528_v45 }
 0x2b8   :  { %v572_v48 = vsel %vm553_vm3, %v551_v46, -inf }
 0x2b9   :  { %570 = vmax.xlane.f32.xlu0 %v569_v47  ;;  %573 = vmax.xlane.f32.xlu1 %v572_v48 }
 0x2bd   :  { %576 = vmax.xlane.f32.xlu0 %v575_v50 }
 0x2ca   :  { %644 = vrot.lane.b32.xlu1 %v1524_v8, %s1456_s20 }
 0x2ce   :  { %731 = vrot.lane.b32.xlu1 %v1540_v12, %s1456_s20 }
 0x2d0   :  { %v559_v51 = vpop.xlane.xlu1 %558 }
 0x2d1   :  { %v579_v52 = vsub.f32 %v546_v28, %v559_v51 }
 0x2d2   :  { %729 = vrot.lane.b32.xlu1 %v1545_v14, %s1456_s20  ;;  %v556_v53 = vpop.xlane.xlu0 %555 }
 0x2d3   :  { %642 = vrot.lane.b32.xlu0 %v1526_v10, %s1456_s20  ;;  %v588_v54 = vmul.f32 1.442695, %v579_v52  ;;  %v578_v55 = vsub.f32 %v545_v31, %v556_v53 }
 0x2d5   :  { %1306 = vpow2.f32 %v588_v54  ;;  %v586_v56 = vmul.f32 1.442695, %v578_v55 }
 0x2d6   :  { %816 = vrot.lane.b32.xlu1 %v1543_v13, %s1456_s20 }
 0x2d7   :  { %818 = vrot.lane.b32.xlu0 %v1538_v11, %s1456_s20  ;;  %1308 = vpow2.f32 %v586_v56 }
 0x2e2   :  { %v1614_v57 = vpop.eup %1306 }
 0x2e3   :  { %v605_v58 = vsel %vm553_vm3, %v1614_v57, 0.0 }
 0x2e4   :  { %v1618_v59 = vpop.eup %1308 }
 0x2e5   :  { %v602_v60 = vsel %vm553_vm3, %v1618_v59, 0.0 }
 0x2f6   :  { %606 = vadd.xlane.f32.xlu0 %v605_v58 }
 0x2fa   :  { %603 = vadd.xlane.f32.xlu1 %v602_v60 }
 0x33a   :  { %v562_v61 = vpop.xlane.xlu0 %561 }
 0x33b   :  { %v580_v62 = vsub.f32 %v547_v35, %v562_v61  ;;  %v1030_v61 = vld [vmem:[#allocation8 + $0x18] sm:$0xff] }
 0x33c   :  { %1281 = vmatprep.subr.mxu0 %v1030_v61 }
 0x33d   :  { %v590_v63 = vmul.f32 1.442695, %v580_v62  ;;  %v1029_v62 = vld [vmem:[#allocation8 + $0x10] sm:$0xff]  ;;  %1282 = vmatpush3.msra.mxu0 %v1030_v61 }
 0x33e   :  { %v565_v0 = vpop.xlane.xlu0 %564  ;;  %v568_v1 = vpop.xlane.xlu1 %567  ;;  %1283 = vmatprep.subr.mxu0 %v1029_v62 }
 0x33f   :  { %1310 = vpow2.f32 %v590_v63  ;;  %v581_v2 = vsub.f32 %v548_v38, %v565_v0  ;;  %v582_v3 = vsub.f32 %v549_v40, %v568_v1  ;;  %v1028_v0 = vld [vmem:[#allocation8 + $0x8] sm:$0xff]  ;;  %1284 = vmatpush3.msra.mxu0 %v1029_v62 }
 0x340   :  { %1285 = vmatprep.subr.mxu0 %v1028_v0 }
 0x341   :  { %v592_v4 = vmul.f32 1.442695, %v581_v2  ;;  %v594_v5 = vmul.f32 1.442695, %v582_v3  ;;  %v1027_v2 = vld [vmem:[#allocation8] sm:$0xff]  ;;  %1286 = vmatpush3.msra.mxu0 %v1028_v0 }
 0x342   :  { %v571_v6 = vpop.xlane.xlu0 %570  ;;  %v574_v7 = vpop.xlane.xlu1 %573  ;;  %1287 = vmatprep.subr.mxu0 %v1027_v2 }
 0x343   :  { %1312 = vpow2.f32 %v592_v4  ;;  %v583_v8 = vsub.f32 %v550_v44, %v571_v6  ;;  %v584_v9 = vsub.f32 %v551_v46, %v574_v7  ;;  %1288 = vmatpush3.msra.mxu0 %v1027_v2 }
 0x344   :  { %1314 = vpow2.f32 %v594_v5 }
 0x345   :  { %v596_v10 = vmul.f32 1.442695, %v583_v8  ;;  %v598_v11 = vmul.f32 1.442695, %v584_v9 }
 0x346   :  { %v577_v12 = vpop.xlane.xlu0 %576  ;;  %v645_v13 = vpop.permute.xlu1 %644 }
 0x347   :  { %1316 = vpow2.f32 %v596_v10  ;;  %v585_v14 = vsub.f32 %v552_v49, %v577_v12  ;;  %1253 = vmatprep.subr.mxu1 %v645_v13 }
 0x348   :  { %1318 = vpow2.f32 %v598_v11  ;;  %1254 = vmatpush3.msra.mxu1 %v645_v13 }
 0x349   :  { %v600_v17 = vmul.f32 1.442695, %v585_v14 }
 0x34a   :  { %v643_v18 = vpop.permute.xlu0 %642  ;;  %v732_v20 = vpop.permute.xlu1 %731 }
 0x34b   :  { %1320 = vpow2.f32 %v600_v17  ;;  %1255 = vmatprep.subr.mxu1 %v643_v18  ;;  %v1167_v17 = vld [vmem:[%s1663_s4] ss:$0 sm:$0xff] }
 0x34c   :  { %v1311_v19 = vpop.eup %1310  ;;  %1256 = vmatpush3.msra.mxu1 %v643_v18 }
 0x34d   :  { %1260 = vmatprep.subr.mxu1 %v732_v20  ;;  %v608_v21 = vsel %vm553_vm3, %v1311_v19, 0.0 }
 0x34e   :  { %609 = vadd.xlane.f32.xlu1 %v608_v21  ;;  %v730_v32 = vpop.permute.xlu1 %729  ;;  %v819_v33 = vpop.permute.xlu0 %818 }
 0x350   :  { %v1313_v22 = vpop.eup %1312 }
 0x351   :  { %v1315_v23 = vpop.eup %1314  ;;  %v611_v24 = vsel %vm553_vm3, %v1313_v22, 0.0 }
 0x352   :  { %612 = vadd.xlane.f32.xlu0 %v611_v24  ;;  %v614_v25 = vsel %vm553_vm3, %v1315_v23, 0.0  ;;  %v817_v34 = vpop.permute.xlu1 %816 }
 0x353   :  { %615 = vadd.xlane.f32.xlu1 %v614_v25 }
 0x354   :  { %v1317_v26 = vpop.eup %1316 }
 0x355   :  { %v1319_v27 = vpop.eup %1318  ;;  %v617_v28 = vsel %vm553_vm3, %v1317_v26, 0.0 }
 0x356   :  { %618 = vadd.xlane.f32.xlu0 %v617_v28  ;;  %v620_v29 = vsel %vm553_vm3, %v1319_v27, 0.0 }
 0x357   :  { %621 = vadd.xlane.f32.xlu1 %v620_v29 }
 0x358   :  { %v1321_v30 = vpop.eup %1320 }
 0x359   :  { %v623_v31 = vsel %vm553_vm3, %v1321_v30, 0.0 }
 0x35a   :  { %624 = vadd.xlane.f32.xlu0 %v623_v31 }
 0x368   :  { %903 = vrot.lane.b32.xlu1 %v1551_v15, %s1456_s20 }
 0x370   :  { %905 = vrot.lane.b32.xlu0 %v1553_v16, %s1456_s20 }
 0x37f   :  { %v607_v35 = vpop.xlane.xlu0 %606 }
 0x380   :  { %1322 = vrcp.f32 %v607_v35 }
 0x383   :  { %v604_v36 = vpop.xlane.xlu1 %603 }
 0x384   :  { %1324 = vrcp.f32 %v604_v36 }
 0x38d   :  { %v1323_v37 = vpop.eup %1322 }
 0x38e   :  { %v629_v40 = vmul.f32 %v1323_v37, %v1614_v57 }
 0x391   :  { %v1325_v38 = vpop.eup %1324 }
 0x392   :  { %v627_v39 = vmul.f32 %v1325_v38, %v1618_v59 }
 0x394   :  { %1257 = vmatprep.mubr.msk.f32.mxu1 %vm553_vm3, %v627_v39 }
 0x395   :  { %1258 = vmatmul.mubr.msk.f32.vlgmr.msra.gmra.mxu1 %vm553_vm3, %v629_v40 }
 0x396   :  { %1261 = vmatpush3.msra.mxu1 %v732_v20 }
 0x397   :  { %1262 = vmatprep.subr.mxu1 %v730_v32 }
 0x398   :  { %1263 = vmatpush3.msra.mxu1 %v730_v32 }
 0x399   :  { %1267 = vmatprep.subr.mxu1 %v819_v33 }
 0x3d7   :  { %v610_v15 = vpop.xlane.xlu1 %609 }
 0x3d8   :  { %1326 = vrcp.f32 %v610_v15 }
 0x3db   :  { %v613_v16 = vpop.xlane.xlu0 %612 }
 0x3dc   :  { %1328 = vrcp.f32 %v613_v16  ;;  %v616_v41 = vpop.xlane.xlu1 %615 }
 0x3dd   :  { %1330 = vrcp.f32 %v616_v41 }
 0x3df   :  { %v619_v42 = vpop.xlane.xlu0 %618 }
 0x3e0   :  { %1332 = vrcp.f32 %v619_v42  ;;  %v622_v43 = vpop.xlane.xlu1 %621 }
 0x3e1   :  { %1334 = vrcp.f32 %v622_v43 }
 0x3e3   :  { %v625_v44 = vpop.xlane.xlu0 %624 }
 0x3e4   :  { %1336 = vrcp.f32 %v625_v44  ;;  %v904_v57 = vpop.permute.xlu1 %903 }
 0x3e5   :  { %v1327_v45 = vpop.eup %1326 }
 0x3e6   :  { %v631_v46 = vmul.f32 %v1327_v45, %v1311_v19 }
 0x3e7   :  { %v906_v54 = vpop.permute.xlu0 %905 }
 0x3e8   :  { %1264 = vmatprep.mubr.msk.f32.mxu1 %vm553_vm3, %v631_v46 }
 0x3e9   :  { %v1329_v47 = vpop.eup %1328 }
 0x3ea   :  { %v1331_v48 = vpop.eup %1330  ;;  %v633_v49 = vmul.f32 %v1329_v47, %v1313_v22 }
 0x3eb   :  { %v635_v50 = vmul.f32 %v1331_v48, %v1315_v23 }
 0x3ec   :  { %1265 = vmatmul.mubr.msk.f32.vlgmr.msra.gmra.mxu1 %vm553_vm3, %v633_v49 }
 0x3ed   :  { %v1333_v51 = vpop.eup %1332  ;;  %1268 = vmatpush3.msra.mxu1 %v819_v33  ;;  %1271 = vmatprep.mubr.msk.f32.mxu1 %vm553_vm3, %v635_v50 }
 0x3ee   :  { %v1335_v52 = vpop.eup %1334  ;;  %1269 = vmatprep.subr.mxu1 %v817_v34  ;;  %v637_v53 = vmul.f32 %v1333_v51, %v1317_v26 }
 0x3ef   :  { %1270 = vmatpush3.msra.mxu1 %v817_v34  ;;  %v639_v55 = vmul.f32 %v1335_v52, %v1319_v27 }
 0x3f0   :  { %1274 = vmatprep.subr.mxu1 %v906_v54  ;;  %1272 = vmatmul.mubr.msk.f32.vlgmr.msra.gmra.mxu1 %vm553_vm3, %v637_v53 }
 0x3f1   :  { %v1337_v56 = vpop.eup %1336  ;;  %1275 = vmatpush3.msra.mxu1 %v906_v54  ;;  %1278 = vmatprep.mubr.msk.f32.mxu1 %vm553_vm3, %v639_v55 }
 0x3f2   :  { %1276 = vmatprep.subr.mxu1 %v904_v57  ;;  %v641_v58 = vmul.f32 %v1337_v56, %v1321_v30 }
 0x3f3   :  { %1277 = vmatpush3.msra.mxu1 %v904_v57 }
 0x3f4   :  { %1279 = vmatmul.mubr.msk.f32.vlgmr.msra.gmra.mxu1 %vm553_vm3, %v641_v58 }
 0x455   :  { %v1259_v59 = vpop.f32.mrf.mxu1 }
 0x456   :  { %991 = vst.msk [vmem:[#allocation2 + $0x8] sm:$0xff] %vm192_vm1, %v1259_v59 }
 0x457   :  { %v720_v60 = vpop.f32.mrf.mxu1 }
 0x458   :  { %990 = vst.msk [vmem:[#allocation2] sm:$0xff] %vm192_vm1, %v720_v60 }
 0x4ac   :  { %v1266_v63 = vpop.f32.mrf.mxu1 }
 0x4ad   :  { %996 = vrot.lane.b32.xlu1 %v1266_v63, %s1449_s27 }
 0x4ae   :  { %v807_v1 = vpop.f32.mrf.mxu1 }
 0x4af   :  { %994 = vrot.lane.b32.xlu0 %v807_v1, %s1449_s27 }
 0x4b0   :  { %v1273_v3 = vpop.f32.mrf.mxu1 }
 0x4b1   :  { %1007 = vrot.lane.b32.xlu1 %v1273_v3, %s1457_s21 }
 0x4b2   :  { %v894_v4 = vpop.f32.mrf.mxu1 }
 0x4b3   :  { %1005 = vrot.lane.b32.xlu0 %v894_v4, %s1457_s21 }
 0x4b4   :  { %v1280_v5 = vpop.f32.mrf.mxu1 }
 0x4b5   :  { %1018 = vrot.lane.b32.xlu1 %v1280_v5, %s1458_s22 }
 0x4b6   :  { %v981_v6 = vpop.f32.mrf.mxu1 }
 0x4b7   :  { %1016 = vrot.lane.b32.xlu0 %v981_v6, %s1458_s22 }
 0x51f   :  { %v997_v7 = vpop.permute.xlu1 %996 }
 0x520   :  { %1002 = vst.msk [vmem:[#allocation2 + $0x8] sm:$0xff] %vm1000_vm5, %v997_v7 }
 0x521   :  { %v995_v8 = vpop.permute.xlu0 %994 }
 0x522   :  { %1001 = vst.msk [vmem:[#allocation2] sm:$0xff] %vm1000_vm5, %v995_v8 }
 0x523   :  { %v1008_v9 = vpop.permute.xlu1 %1007 }
 0x524   :  { %1013 = vst.msk [vmem:[#allocation2 + $0x8] sm:$0xff] %vm1011_vm6, %v1008_v9 }
 0x525   :  { %v1006_v10 = vpop.permute.xlu0 %1005 }
 0x526   :  { %1012 = vst.msk [vmem:[#allocation2] sm:$0xff] %vm1011_vm6, %v1006_v10 }
 0x527   :  { %v1019_v11 = vpop.permute.xlu1 %1018 }
 0x528   :  { %1024 = vst.msk [vmem:[#allocation2 + $0x8] sm:$0xff] %vm1022_vm7, %v1019_v11 }
 0x529   :  { %v1017_v12 = vpop.permute.xlu0 %1016 }
 0x52a   :  { %1023 = vst.msk [vmem:[#allocation2] sm:$0xff] %vm1022_vm7, %v1017_v12 }
 0x52f   :  { %v1026_v14 = vld [vmem:[#allocation2 + $0x8] sm:$0xff] }
 0x531   :  { %v1025_v13 = vld [vmem:[#allocation2] sm:$0xff] }
 0x532   :  { %1289 = vmatprep.mubr.msk.f32.mxu0 %vm92_vm0, %v1025_v13 }
 0x533   :  { %1290 = vmatmul.mubr.msk.f32.vlgmr.msra.gmra.mxu0 %vm92_vm0, %v1026_v14 }
 0x5f3   :  { %v1291_v18 = vpop.f32.mrf.mxu0 }
 0x5f4   :  { %v1116_v19 = vadd.f32 %v1291_v18, %v1167_v17 }
 0x5f5   :  { %v1110_v20 = vpop.f32.mrf.mxu0 }
 0x5f6   :  { %1120 = vst.msk [vmem:[#allocation11 + $0x8] sm:$0xff] %vm92_vm0, %v1116_v19  ;;  %v1111_v21 = vadd.f32 %v1167_v17, %v1110_v20 }
 0x5f8   :  { %1119 = vst.msk [vmem:[#allocation11] sm:$0xff] %vm92_vm0, %v1111_v21 }
 0x5f9   :  { %1429 = shalt.err (!%p1426_p10)
}
 0x5fa   :  { %1132 = dma.vmem_to_hbm [thread:$0]  %s1127_s28, 256, %s1665_s6, [#allocation5], %s1448_s26, %s1448_s26, %s1449_s27  }
 0x5fb   :  { %1444 = dma.done.wait [#allocation5], 256  }
 0x5fc   :  { %1445 = vsyncadd [#allocation5], 4294967040 }
 0x5fd   :  { %1136 = vsyncpa [#allocation4], 1 }
 0x5fe   :  { %1137 = vsyncpa [#allocation7], 1 }
 0x5ff   :  { %1138 = vsyncpa [#allocation10], 1 }
 0x600   :  { %1139 = vsyncpa [#allocation5], 1 }

</bundles_post_ra>
